<compile_context>
chip_gen: v7x
topology: tpu7x:2x2x1
jax: 0.10.0
libtpu: 0.0.40
codegen_flags: <defaults>
</compile_context>

<pallas_src>
import functools

import jax
import jax.numpy as jnp
from jax.experimental import pallas as pl
from jax.experimental.pallas import tpu as pltpu


def _beamforming_kernel(s_ref, cc_ref, cov_ref, pp_ref, out_ref, *,
                        num_angles, inv_num_sensors):
    n_pad = pp_ref.shape[0]
    tb, _, a_pad = s_ref.shape

    # Sensor-position sums (hoisted from einsum('nm,bna->bna', ...)).
    p = pp_ref[:, 0:1].reshape(1, n_pad, 1)     # sum_m array[n, m]
    p2 = pp_ref[:, 1:2].reshape(1, n_pad, 1)    # sum_m array[n, m]^2

    s_coef = s_ref[...]                          # (TB, 1, A_pad): pi*d*sin(theta)
    c_coef = cc_ref[...]                         # (TB, 1, A_pad): -0.5*pi*(d*cos)^2/r

    # phi[b, n, a] = p[n]*S[b, a] + p2[n]*Cc[b, a]
    phi = p * s_coef + p2 * c_coef               # (TB, N_pad, A_pad)
    sr = jnp.cos(phi)                            # Re(steering vector)
    si = jnp.sin(phi)                            # Im(steering vector)

    # Two batched MXU pushes (no lane concatenate):
    #   cov = [Cr; Ci] along the sensor (sublane) axis.
    cov = cov_ref[...]                           # (TB, 2*N_pad, N_pad)
    t_r = jnp.einsum('bxn,bna->bxa', cov, sr,
                     preferred_element_type=jnp.float32)   # [Cr@sr; Ci@sr]
    t_i = jnp.einsum('bxn,bna->bxa', cov, si,
                     preferred_element_type=jnp.float32)   # [Cr@si; Ci@si]

    # Re(s_a^H C s_a), reduced over sensors (general complex C, no Hermitian
    # assumption): sr*(Cr@sr - Ci@si) + si*(Cr@si + Ci@sr).
    quad = (sr * (t_r[:, :n_pad, :] - t_i[:, n_pad:, :])
            + si * (t_i[:, :n_pad, :] + t_r[:, n_pad:, :]))   # (TB, N_pad, A_pad)
    per_angle = jnp.sum(quad, axis=1, keepdims=True)          # (TB, 1, A_pad)

    # Mask padded angle lanes, reduce over angles, fold in 1/N (compile-time).
    lane = jax.lax.broadcasted_iota(jnp.int32, (1, 1, a_pad), 2)
    mask = (lane < num_angles).astype(jnp.float32)
    total = jnp.sum(per_angle * mask, axis=-1,
                    keepdims=True) * inv_num_sensors           # (TB, 1, 1)

    # Lane-dense unmasked store: per-batch scalar broadcast across 128 lanes.
    out_ref[...] = jnp.broadcast_to(total, out_ref.shape).astype(out_ref.dtype)


def beamforming_loss(array, sensors_distance, *, angles, ranges, covariance,
                     aggregate='sum', tb_max=64):
    """Pallas implementation of BeamFromingLoss.forward."""
    N = array.shape[0]
    d = float(sensors_distance)
    arr32 = array.astype(jnp.float32)

    B, A = angles.shape
    A_pad = ((A + 127) // 128) * 128     # lane-dense angle axis
    N_pad = ((N + 7) // 8) * 8           # sublane-aligned sensor axis

    # --- hoisted angle-only math (sin/cos/recip/*pi done once, in the wrapper)
    ang = angles.astype(jnp.float32)
    rng = ranges.astype(jnp.float32)
    s_coef = jnp.pi * d * jnp.sin(ang)                        # (B, A)
    c_coef = -0.5 * jnp.pi * (d * jnp.cos(ang)) ** 2 / rng    # (B, A)

    # --- p / p2 merged into a single (N_pad, 2) input -------------------------
    p = jnp.sum(arr32, axis=1)            # (N,)
    p2 = jnp.sum(arr32 ** 2, axis=1)      # (N,)
    pp = jnp.stack([p, p2], axis=1)       # (N, 2)
    pp = jnp.pad(pp, ((0, N_pad - N), (0, 0)))

    # --- covariance: one fused real/imag/stack/pad pass -> (B, 2*N_pad, N_pad)
    cov_r = jnp.pad(jnp.real(covariance).astype(jnp.float32),
                    ((0, 0), (0, N_pad - N), (0, N_pad - N)))
    cov_i = jnp.pad(jnp.imag(covariance).astype(jnp.float32),
                    ((0, 0), (0, N_pad - N), (0, N_pad - N)))
    cov2 = jnp.concatenate([cov_r, cov_i], axis=1)

    # --- batch blocking --------------------------------------------------------
    # VMEM heuristic: ~14 f32 temporaries of (TB, N_pad, A_pad) + double-buffered
    # input/output blocks; keep the tile well under v7x's 64 MiB.
    per_batch_bytes = 4 * (14 * N_pad * A_pad
                           + 2 * 2 * N_pad * N_pad
                           + 2 * 2 * A_pad
                           + 2 * 128)
    TB = max(1, min(tb_max, (24 * 1024 * 1024) // max(per_batch_bytes, 1)))
    if B >= 2:
        TB = min(TB, -(-B // 2))   # keep >=2 grid steps so both v7x TCs get work
    TB = min(TB, B)
    n_blocks = -(-B // TB)
    B_pad = n_blocks * TB

    pad_b = B_pad - B
    pad_a = A_pad - A
    # Padded lanes/batches carry zeros -> phi=0, sr=1, si=0; padded cov rows /
    # columns are zero so their contribution vanishes; lanes are masked anyway.
    s3 = jnp.pad(s_coef, ((0, pad_b), (0, pad_a))).reshape(B_pad, 1, A_pad)
    c3 = jnp.pad(c_coef, ((0, pad_b), (0, pad_a))).reshape(B_pad, 1, A_pad)
    cov2 = jnp.pad(cov2, ((0, pad_b), (0, 0), (0, 0)))

    OUT_L = 128
    kernel = functools.partial(_beamforming_kernel,
                               num_angles=A,
                               inv_num_sensors=1.0 / N)

    cost = pl.CostEstimate(
        flops=int(B_pad * (2 * 2 * (2 * N_pad) * N_pad * A_pad
                           + 10 * N_pad * A_pad)),
        transcendentals=int(B_pad * 2 * N_pad * A_pad),
        bytes_accessed=int(4 * (cov2.size + s3.size + c3.size + pp.size
                                + B_pad * OUT_L)))

    out3 = pl.pallas_call(
        kernel,
        out_shape=jax.ShapeDtypeStruct((B_pad, 1, OUT_L), jnp.float32),
        grid=(n_blocks,),
        in_specs=[
            pl.BlockSpec((TB, 1, A_pad), lambda g: (g, 0, 0)),
            pl.BlockSpec((TB, 1, A_pad), lambda g: (g, 0, 0)),
            pl.BlockSpec((TB, 2 * N_pad, N_pad), lambda g: (g, 0, 0)),
            pl.BlockSpec((N_pad, 2), lambda g: (0, 0)),
        ],
        out_specs=pl.BlockSpec((TB, 1, OUT_L), lambda g: (g, 0, 0)),
        compiler_params=pltpu.CompilerParams(
            dimension_semantics=("parallel",),
            vmem_limit_bytes=48 * 1024 * 1024),
        cost_estimate=cost,
    )(s3, c3, cov2, pp)

    bf = out3[:B, 0, 0]                                       # (B,)

    if aggregate == 'sum':
        loss = jnp.sum(bf)
    elif aggregate == 'mean':
        loss = jnp.mean(bf)
    else:
        loss = bf
    return -loss


def beamforming_loss_ref(array, sensors_distance, *, angles, ranges, covariance,
                         aggregate='sum'):
    """Plain-JAX reference mirroring the PyTorch forward (float32/complex64)."""
    N = array.shape[0]
    ang = angles[..., None].astype(jnp.float32)   # (B, A, 1)
    rng = ranges[..., None].astype(jnp.float32)   # (B, A, 1)
    arr = array.astype(jnp.float32)
    arr_sq = arr ** 2
    x1 = jnp.transpose(jnp.tile(jnp.sin(ang), (1, 1, N)), (0, 2, 1)) * sensors_distance
    ph1 = jnp.sum(arr, axis=1)[None, :, None] * x1
    x2 = -0.5 * (jnp.cos(ang) * sensors_distance) ** 2 / rng
    x2 = jnp.transpose(jnp.tile(x2, (1, 1, N)), (0, 2, 1))
    ph2 = jnp.sum(arr_sq, axis=1)[None, :, None] * x2
    sv = jnp.exp(1j * jnp.pi * (ph1 + ph2))       # (B, N, A) complex64
    bf = jnp.einsum('bak,bkl->bal', jnp.conj(jnp.transpose(sv, (0, 2, 1))), covariance)
    bf = jnp.einsum('ban,bna->ba', bf, sv)
    bf = jnp.real(jnp.sum(bf, axis=-1)) / N
    if aggregate == 'sum':
        loss = jnp.sum(bf)
    elif aggregate == 'mean':
        loss = jnp.mean(bf)
    else:
        loss = bf
    return -loss


if __name__ == "__main__":
    # Small shapes that exercise every padding path:
    #   B=5 -> batch-block padding, A=11 -> lane padding/mask, N=6 -> sublane
    #   padding, M=3 -> multi-column sensor array.
    B, A, N, M = 5, 11, 6, 3
    sensors_distance = 0.5

    # Deterministic "module parameter": sensor position array (N, M).
    array = (jnp.arange(N * M, dtype=jnp.float32).reshape(N, M) / (N * M) - 0.5)

    key = jax.random.PRNGKey(0)
    k1, k2, k3, k4 = jax.random.split(key, 4)
    angles = jax.random.uniform(k1, (B, A), minval=-jnp.pi / 2, maxval=jnp.pi / 2,
                                dtype=jnp.float32)
    ranges = jax.random.uniform(k2, (B, A), minval=1.0, maxval=10.0,
                                dtype=jnp.float32)
    cov_r = jax.random.normal(k3, (B, N, N), dtype=jnp.float32)
    cov_i = jax.random.normal(k4, (B, N, N), dtype=jnp.float32)
    covariance = (cov_r + 1j * cov_i).astype(jnp.complex64)

    loss = beamforming_loss(array, sensors_distance, angles=angles, ranges=ranges,
                            covariance=covariance, aggregate='sum')
    loss = jax.block_until_ready(loss)

    loss_ref = beamforming_loss_ref(array, sensors_distance, angles=angles,
                                    ranges=ranges, covariance=covariance,
                                    aggregate='sum')
    assert jnp.allclose(loss, loss_ref, rtol=1e-2, atol=1e-2), (loss, loss_ref)

    print("KERNEL_OK")
</pallas_src>

<mosaic_0001>
module attributes {stable_mosaic.version = 11 : i64} {
  func.func @_beamforming_kernel(%arg0: i32, %arg1: memref<3x1x128xf32, #tpu.memory_space<vmem>>, %arg2: memref<3x1x128xf32, #tpu.memory_space<vmem>>, %arg3: memref<3x16x8xf32, #tpu.memory_space<vmem>>, %arg4: memref<8x2xf32, #tpu.memory_space<vmem>>, %arg5: memref<3x1x128xf32, #tpu.memory_space<vmem>>) attributes {dimension_semantics = [#tpu.dimension_semantics<parallel>], iteration_bounds = array<i64: 2>, scalar_prefetch = 0 : i64, scratch_operands = 0 : i64, tpu.core_type = #tpu.core_type<tc>, window_params = [{transform_indices = @transform_0, window_bounds = array<i64: 3, 1, 128>}, {transform_indices = @transform_1, window_bounds = array<i64: 3, 1, 128>}, {transform_indices = @transform_2, window_bounds = array<i64: 3, 16, 8>}, {pipeline_mode = #tpu.pipeline_mode<synchronous>, transform_indices = @transform_3, window_bounds = array<i64: 8, 2>}, {transform_indices = @transform_4, window_bounds = array<i64: 3, 1, 128>}]} {
    %c0 = arith.constant 0 : index
    %c0_0 = arith.constant 0 : index
    %0 = vector.load %arg4[%c0, %c0_0] : memref<8x2xf32, #tpu.memory_space<vmem>>, vector<8x1xf32>
    %1 = vector.shape_cast %0 : vector<8x1xf32> to vector<1x8x1xf32>
    %c0_1 = arith.constant 0 : index
    %c1 = arith.constant 1 : index
    %2 = vector.load %arg4[%c0_1, %c1] : memref<8x2xf32, #tpu.memory_space<vmem>>, vector<8x1xf32>
    %3 = vector.shape_cast %2 : vector<8x1xf32> to vector<1x8x1xf32>
    %c0_2 = arith.constant 0 : index
    %c0_3 = arith.constant 0 : index
    %c0_4 = arith.constant 0 : index
    %4 = vector.load %arg1[%c0_2, %c0_3, %c0_4] : memref<3x1x128xf32, #tpu.memory_space<vmem>>, vector<3x1x128xf32>
    %c0_5 = arith.constant 0 : index
    %c0_6 = arith.constant 0 : index
    %c0_7 = arith.constant 0 : index
    %5 = vector.load %arg2[%c0_5, %c0_6, %c0_7] : memref<3x1x128xf32, #tpu.memory_space<vmem>>, vector<3x1x128xf32>
    %6 = vector.broadcast %1 : vector<1x8x1xf32> to vector<3x8x128xf32>
    %7 = vector.broadcast %4 : vector<3x1x128xf32> to vector<3x8x128xf32>
    %8 = arith.mulf %6, %7 : vector<3x8x128xf32>
    %9 = vector.broadcast %3 : vector<1x8x1xf32> to vector<3x8x128xf32>
    %10 = vector.broadcast %5 : vector<3x1x128xf32> to vector<3x8x128xf32>
    %11 = arith.mulf %9, %10 : vector<3x8x128xf32>
    %12 = arith.addf %8, %11 : vector<3x8x128xf32>
    %13 = math.cos %12 : vector<3x8x128xf32>
    %14 = math.sin %12 : vector<3x8x128xf32>
    %c0_8 = arith.constant 0 : index
    %c0_9 = arith.constant 0 : index
    %c0_10 = arith.constant 0 : index
    %15 = vector.load %arg3[%c0_8, %c0_9, %c0_10] : memref<3x16x8xf32, #tpu.memory_space<vmem>>, vector<3x16x8xf32>
    "tpu.trace_start"() <{level = 10 : i32, message = "bxn,bna->bxa"}> : () -> ()
    %cst = arith.constant dense<0.000000e+00> : vector<3x16x128xf32>
    %16 = tpu.matmul %15, %13, %cst {dimension_numbers = #tpu.dot_dimension_numbers<[2], [1], [1], [2], [0, 0, 0, 1, 1, 2], [0], [0]>} : vector<3x16x8xf32>, vector<3x8x128xf32>, vector<3x16x128xf32> -> vector<3x16x128xf32>
    %cst_11 = arith.constant dense<0.000000e+00> : vector<3x16x128xf32>
    %17 = tpu.matmul %15, %14, %cst_11 {dimension_numbers = #tpu.dot_dimension_numbers<[2], [1], [1], [2], [0, 0, 0, 1, 1, 2], [0], [0]>} : vector<3x16x8xf32>, vector<3x8x128xf32>, vector<3x16x128xf32> -> vector<3x16x128xf32>
    "tpu.trace_stop"() : () -> ()
    %18 = vector.extract_strided_slice %16 {offsets = [0, 0, 0], sizes = [3, 8, 128], strides = [1, 1, 1]} : vector<3x16x128xf32> to vector<3x8x128xf32>
    %19 = vector.extract_strided_slice %17 {offsets = [0, 8, 0], sizes = [3, 8, 128], strides = [1, 1, 1]} : vector<3x16x128xf32> to vector<3x8x128xf32>
    %20 = arith.subf %18, %19 : vector<3x8x128xf32>
    %21 = arith.mulf %13, %20 : vector<3x8x128xf32>
    %22 = vector.extract_strided_slice %17 {offsets = [0, 0, 0], sizes = [3, 8, 128], strides = [1, 1, 1]} : vector<3x16x128xf32> to vector<3x8x128xf32>
    %23 = vector.extract_strided_slice %16 {offsets = [0, 8, 0], sizes = [3, 8, 128], strides = [1, 1, 1]} : vector<3x16x128xf32> to vector<3x8x128xf32>
    %24 = arith.addf %22, %23 : vector<3x8x128xf32>
    %25 = arith.mulf %14, %24 : vector<3x8x128xf32>
    %26 = arith.addf %21, %25 : vector<3x8x128xf32>
    %cst_12 = arith.constant dense<0.000000e+00> : vector<3x128xf32>
    %27 = vector.multi_reduction <add>, %26, %cst_12 [1] : vector<3x8x128xf32> to vector<3x128xf32>
    %28 = vector.shape_cast %27 : vector<3x128xf32> to vector<3x1x128xf32>
    %29 = tpu.iota {dimensions = array<i32: 2>} : vector<1x1x128xi32>
    %c11_i32 = arith.constant 11 : i32
    %30 = vector.broadcast %c11_i32 : i32 to vector<1x1x128xi32>
    %31 = arith.cmpi slt, %29, %30 : vector<1x1x128xi32>
    %32 = arith.extui %31 : vector<1x1x128xi1> to vector<1x1x128xi32>
    %33 = arith.sitofp %32 : vector<1x1x128xi32> to vector<1x1x128xf32>
    %34 = vector.broadcast %33 : vector<1x1x128xf32> to vector<3x1x128xf32>
    %35 = arith.mulf %28, %34 : vector<3x1x128xf32>
    %cst_13 = arith.constant dense<0.000000e+00> : vector<3x1xf32>
    %36 = vector.multi_reduction <add>, %35, %cst_13 [2] : vector<3x1x128xf32> to vector<3x1xf32>
    %37 = vector.shape_cast %36 : vector<3x1xf32> to vector<3x1x1xf32>
    %cst_14 = arith.constant 0.166666672 : f32
    %38 = vector.broadcast %cst_14 : f32 to vector<3x1x1xf32>
    %39 = arith.mulf %37, %38 : vector<3x1x1xf32>
    %40 = vector.shape_cast %39 : vector<3x1x1xf32> to vector<3x1x1xf32>
    %41 = vector.broadcast %40 : vector<3x1x1xf32> to vector<3x1x128xf32>
    %c0_15 = arith.constant 0 : index
    %c0_16 = arith.constant 0 : index
    %c0_17 = arith.constant 0 : index
    %42 = vector.load %arg5[%c0_15, %c0_16, %c0_17] : memref<3x1x128xf32, #tpu.memory_space<vmem>>, vector<3x1x128xf32>
    tpu.vector_store %arg5[%c0_15, %c0_16, %c0_17], %41 {strides = array<i32>} : memref<3x1x128xf32, #tpu.memory_space<vmem>>, vector<3x1x128xf32>,
    return
  }
  func.func @transform_0(%arg0: i32) -> (i32, i32, i32) {
    %c0_i32 = arith.constant 0 : i32
    %c0_i32_0 = arith.constant 0 : i32
    %c0_i32_1 = arith.constant 0 : i32
    return %arg0, %c0_i32, %c0_i32_0 : i32, i32, i32
  }
  func.func @transform_1(%arg0: i32) -> (i32, i32, i32) {
    %c0_i32 = arith.constant 0 : i32
    %c0_i32_0 = arith.constant 0 : i32
    %c0_i32_1 = arith.constant 0 : i32
    return %arg0, %c0_i32, %c0_i32_0 : i32, i32, i32
  }
  func.func @transform_2(%arg0: i32) -> (i32, i32, i32) {
    %c0_i32 = arith.constant 0 : i32
    %c0_i32_0 = arith.constant 0 : i32
    %c0_i32_1 = arith.constant 0 : i32
    return %arg0, %c0_i32, %c0_i32_0 : i32, i32, i32
  }
  func.func @transform_3(%arg0: i32) -> (i32, i32) {
    %c0_i32 = arith.constant 0 : i32
    %c0_i32_0 = arith.constant 0 : i32
    %c0_i32_1 = arith.constant 0 : i32
    return %c0_i32, %c0_i32_0 : i32, i32
  }
  func.func @transform_4(%arg0: i32) -> (i32, i32, i32) {
    %c0_i32 = arith.constant 0 : i32
    %c0_i32_0 = arith.constant 0 : i32
    %c0_i32_1 = arith.constant 0 : i32
    return %arg0, %c0_i32, %c0_i32_0 : i32, i32, i32
  }
}

</mosaic_0001>

<bundles_post_ra>
// kernel: tpu_custom_call.1
= control target key start
LH: loop header
LB: loop body
LE: loop exit
PB: predicated region body
PF: predicated region fallthrough
CT: control target
= control target key end

     0   :  { %9 = vsyncpa [#allocation3], 0  ;;  %s2191_s0 = inlined_call_operand.vmem [shape: f32[6,1,128], index: 0, kind: input, shape index: {}]   ;;  %s2192_s1 = inlined_call_operand.vmem [shape: f32[6,1,128], index: 1, kind: input, shape index: {}]   ;;  %s2193_s2 = inlined_call_operand.vmem [shape: f32[6,16,8], index: 2, kind: input, shape index: {}]   ;;  %s2194_s3 = inlined_call_operand.vmem [shape: f32[8,2], index: 3, kind: input, shape index: {}]   ;;  %s2195_s4 = inlined_call_operand.hbm [shape: f32[6,1,128], index: 4, kind: output, shape index: {}]  }
   0x1   :  { %11 = vsyncpa [#allocation3 + $0x1], 0  ;;  %s1824_s15 = smov 0   ;;  %s1826_s16 = smov 0  }
   0x2   :  { %s1828_s17 = smov 0   ;;  %s1830_s18 = smov 0  }
   0x3 LB: > { %s1845_s19 = sadd.s32 4294967295, %s1785_s18   ;;  %s1544_s20 = sadd.s32 4294967294, %s1785_s18   ;;  %s1785_s18 = sphi %s1830_s18, %s2203_s18   ;;  %s1781_s17 = sphi %s1828_s17, %s2202_s17   ;;  %s1777_s16 = sphi %s1826_s16, %s2201_s16   ;;  %s1773_s15 = sphi %s1824_s15, %s2200_s15  }
   0x4   : > { %s1849_s21 = sadd.s32 1, %s1785_s18   ;;  %s123_s22 = sadd.s32 1, %s1781_s17 }
   0x5   : > { %s120_s23 = ssub.s32 %s1785_s18, %s1849_s21  ;;  %p133_p0 = scmp.ne.s32.totalorder %s1781_s17, %s1777_s16 }
   0x6   : > { %p121_p1 = scmp.eq.s32.totalorder %s120_s23, 0  ;;  %p134_p2 = scmp.eq.s32.totalorder %s1845_s19, 1 }
   0x7   : > { %p139_p3 = scmp.ne.s32.totalorder %s1777_s16, %s1773_s15  ;;  %p140_p4 = scmp.eq.s32.totalorder %s1544_s20, 1 }
   0x8   : > { %s1860_s24 = scalar_select %p121_p1, %s1781_s17, %s123_s22  }
   0x9   : > { %p1862_p5 = por %p134_p2, %p133_p0  ;;  %p1866_p6 = por %p140_p4, %p139_p3 }
   0xa   : > { %p1547_p7 = scmp.ge.s32.totalorder %s1785_s18, 1  ;;  %p187_p8 = scmp.lt.s32.totalorder %s1785_s18, 3 }
   0xc   : > { %p188_p9 = pnand %p1547_p7, %p187_p8 }
   0xd   : > { %v240_v0 = vld [vmem:[%s2194_s3] sm:$0xff] (!%p188_p9)  ;;  %v1787_v1 = vmov (!%p188_p9), 0   ;;  %v1788_v2 = vmov (!%p188_p9), 1   ;;  %s222_s29 = smul.u32 (!%p188_p9), 3, %s1845_s19  ;;  %vm928_vm0 = vcmask (!%p188_p9), 64512   ;;  %s219_s14 = sand.u32 (!%p188_p9), 1, %s1777_s16  }
   0xe   : > { %191 = sbr.rel (%p188_p9) target bundleno = 659 (0x293), region = 36  ;;  %1709 = vset.pattern.permute.xlu0 (!%p188_p9), %v1787_v1  ;;  %v1789_v52 = vmov (!%p188_p9), 683565275   ;;  %v1790_v54 = vmov (!%p188_p9), 2475754826   ;;  %s2150_s5 = scalar_lea.sflag (!%p188_p9), [#allocation3], %s219_s14 }
   0xf   : > { %249 = vperm.xlu0 (!%p188_p9), %1709, %v240_v0   ;;  %p223_p10 = scmp.lt.s32.totalorder (!%p188_p9), %s222_s29, 5  ;;  %v1791_v56 = vmov (!%p188_p9), 2131351028   ;;  %v1792_v58 = vmov (!%p188_p9), 2102212464   ;;  %s1646_s20 = smul.u32 (!%p188_p9), 3, %s219_s14 }
  0x10   : > { %v1793_v63 = vmov (!%p188_p9), 920167782   ;;  %s1597_s27 = smul.u32 (!%p188_p9), 48, %s1845_s19  ;;  %s1796_s19 = smov (!%p188_p9), [#allocation2]  }
  0x11   : > { %s221_s22 = scalar_lea.vmem (!%p188_p9), [#allocation2], %s1646_s20 }
  0x12   : > { %s1464_s23 = sshll.u32 (!%p188_p9), %s221_s22, 4  ;;  %s2143_s23 = int_to_ptr.vmem [resolvable:$true] %s1464_s23 }
  0x13   : > { %1710 = vset.pattern.permute.xlu0 (!%p188_p9), %v1788_v2  ;;  %s1723_s6 = scalar_lea.vmem (!%p188_p9), %s2143_s23, 48 }
  0x14   : > { %274 = vperm.xlu0 (!%p188_p9), %1710, %v240_v0   ;;  %p1724_p11 = scmp.ne.s32.totalorder (!%p188_p9), %s2143_s23, %s1723_s6 }
  0x15   : > { %s2205_s29 = smov (!%p223_p10, %s222_s29), 5 }
  0x16   : > { %s1596_s30 = sshll.u32 %s2205_s29, 4  ;;  %s225_s10 = scalar_lea.vmem %s2191_s0, %s2205_s29 }
  0x17   : > { %s1879_s7 = scalar_lea.vmem %s2193_s2, %s1596_s30  ;;  %s230_s13 = scalar_lea.vmem %s2192_s1, %s2205_s29  ;;  %v1550_v6 = vld [vmem:[%s225_s10] ss:$0 sm:$0xff]  ;;  %v1551_v7 = vld [vmem:[%s225_s10 + $0x1] ss:$0 sm:$0xff]  ;;  %v1552_v8 = vld [vmem:[%s225_s10 + $0x2] ss:$0 sm:$0xff] }
  0x18   : > { %v1882_v3 = vld [vmem:[%s1879_s7] sm:$0xff]  ;;  %v1885_v4 = vld [vmem:[%s1879_s7 + $0x10] sm:$0xff]  ;;  %s2148_s30 = scalar_lea.hbm %s2195_s4, %s1597_s27  ;;  %p1725_p12 = pnand %p1724_p11, %p1862_p5 }
  0x19   : > { %1618 = vmatprep.mubr.msk.f32.mxu0 %vm928_vm0, %v1882_v3  ;;  %1623 = vmatprep.mubr.msk.f32.mxu1 %vm928_vm0, %v1885_v4  ;;  %v1553_v9 = vld [vmem:[%s230_s13] ss:$0 sm:$0xff]  ;;  %v1554_v10 = vld [vmem:[%s230_s13 + $0x1] ss:$0 sm:$0xff]  ;;  %v1555_v11 = vld [vmem:[%s230_s13 + $0x2] ss:$0 sm:$0xff] }
  0x1a   : > { %p1726_p13 = pneg %p1725_p12 }
  0x8e   : > { %v250_v5 = vpop.permute.xlu0 %249 }
  0x8f   : > { %v270_v12 = vmul.f32 %v1550_v6, %v250_v5  ;;  %v271_v13 = vmul.f32 %v1551_v7, %v250_v5  ;;  %v272_v15 = vmul.f32 %v1552_v8, %v250_v5  ;;  %v1794_v5 = vmov 1326507024  }
  0x93   : > { %v275_v14 = vpop.permute.xlu0 %274 }
  0x94   : > { %v295_v16 = vmul.f32 %v1553_v9, %v275_v14  ;;  %v296_v17 = vmul.f32 %v1554_v10, %v275_v14  ;;  %v297_v18 = vmul.f32 %v1555_v11, %v275_v14 }
  0x96   : > { %v1897_v19 = vadd.f32 %v295_v16, %v270_v12  ;;  %v1899_v20 = vadd.f32 %v296_v17, %v271_v13  ;;  %v1901_v21 = vadd.f32 %v297_v18, %v272_v15 }
  0x98   : > { %v304_v22 = vand.u32 2139095040, %v1897_v19  ;;  %v407_v23 = vand.u32 2139095040, %v1899_v20  ;;  %v510_v24 = vand.u32 2139095040, %v1901_v21  ;;  %v301_v25 = vand.u32 2147483647, %v1897_v19 }
  0x99   : > { %v404_v26 = vand.u32 2147483647, %v1899_v20 }
  0x9a   : > { %v305_v27 = vshrl.u32 %v304_v22, 23  ;;  %v408_v28 = vshrl.u32 %v407_v23, 23  ;;  %v511_v29 = vshrl.u32 %v510_v24, 23  ;;  %v308_v30 = vand.u32 8388607, %v301_v25 }
  0x9b   : > { %v411_v31 = vand.u32 8388607, %v404_v26 }
  0x9c   : > { %v1556_v32 = vadd.s32 4294967169, %v305_v27  ;;  %v1560_v33 = vadd.s32 4294967169, %v408_v28  ;;  %v1564_v34 = vadd.s32 4294967169, %v511_v29  ;;  %v309_v38 = vor.u32 8388608, %v308_v30 }
  0x9d   : > { %v412_v39 = vor.u32 8388608, %v411_v31 }
  0x9e   : > { %v311_v35 = vadd.s32 1, %v1556_v32  ;;  %v414_v36 = vadd.s32 1, %v1560_v33  ;;  %v517_v37 = vadd.s32 1, %v1564_v34  ;;  %v1916_v46 = vshll.u32 %v309_v38, 8 }
  0x9f   : > { %v1918_v47 = vshll.u32 %v412_v39, 8 }
  0xa0   : > { %vm312_vm1 = vcmp.gt.s32.totalorder %v311_v35, 0  ;;  %vm415_vm2 = vcmp.gt.s32.totalorder %v414_v36, 0  ;;  %vm518_vm3 = vcmp.gt.s32.totalorder %v517_v37, 0 }
  0xa1   : > { %v313_v40 = vsel %vm312_vm1, %v311_v35, 0  ;;  %v416_v41 = vsel %vm415_vm2, %v414_v36, 0  ;;  %v1912_v42 = vsel %vm518_vm3, %v517_v37, 0 }
  0xa2   : > { %v315_v43 = vand.u32 31, %v313_v40  ;;  %v1914_v44 = vand.u32 31, %v416_v41  ;;  %v314_v45 = vshrl.u32 %v313_v40, 5  ;;  %v1920_v49 = vshrl.u32 %v416_v41, 5 }
  0xa3   : > { %v1924_v51 = vand.u32 31, %v1912_v42 }
  0xa4   : > { %v316_v48 = vsub.s32 32, %v315_v43  ;;  %v419_v50 = vsub.s32 32, %v1914_v44  ;;  %v318_v53 = vshll.u32 %v1789_v52, %v315_v43  ;;  %v321_v55 = vshll.u32 %v1790_v54, %v315_v43 }
  0xa5   : > { %v324_v57 = vshll.u32 %v1791_v56, %v315_v43  ;;  %v327_v59 = vshll.u32 %v1792_v58, %v315_v43  ;;  %v330_v0 = vshll.u32 %v1793_v63, %v315_v43  ;;  %vm333_vm4 = vcmp.lt.s32.totalorder %v314_v45, 1 }
  0xa6   : > { %v319_v60 = vshrl.u32 %v1790_v54, %v316_v48  ;;  %v322_v61 = vshrl.u32 %v1791_v56, %v316_v48  ;;  %v325_v62 = vshrl.u32 %v1792_v58, %v316_v48  ;;  %v317_v1 = vshrl.u32 %v1789_v52, %v316_v48 }
  0xa7   : > { %v328_v2 = vshrl.u32 %v1793_v63, %v316_v48  ;;  %v331_v6 = vshrl.u32 %v1794_v5, %v316_v48  ;;  %vm334_vm5 = vcmp.lt.s32.totalorder %v314_v45, 2  ;;  %vm335_vm6 = vcmp.lt.s32.totalorder %v314_v45, 3 }
  0xa8   : > { %v320_v7 = vor.u32 %v319_v60, %v318_v53  ;;  %v323_v8 = vor.u32 %v322_v61, %v321_v55  ;;  %v326_v9 = vor.u32 %v325_v62, %v324_v57  ;;  %vm336_vm7 = vcmp.lt.s32.totalorder %v314_v45, 4 }
  0xa9   : > { %v329_v10 = vor.u32 %v328_v2, %v327_v59  ;;  %v332_v11 = vor.u32 %v331_v6, %v330_v0  ;;  %v420_v22 = vshrl.u32 %v1789_v52, %v419_v50  ;;  %v421_v27 = vshll.u32 %v1789_v52, %v1914_v44 }
  0xaa   : > { %v337_v12 = vsel %vm333_vm4, %v317_v1, %v320_v7  ;;  %v338_v13 = vsel %vm336_vm7, %v326_v9, 2102212464  ;;  %v341_v14 = vsel %vm333_vm4, %v320_v7, %v323_v8  ;;  %v345_v15 = vsel %vm333_vm4, %v323_v8, %v326_v9 }
  0xab   : > { %v339_v16 = vsel %vm335_vm6, %v323_v8, %v338_v13  ;;  %v342_v17 = vsel %vm336_vm7, %v329_v10, 920167782  ;;  %v346_v18 = vsel %vm336_vm7, %v332_v11, 1326507024  ;;  %v422_v28 = vshrl.u32 %v1790_v54, %v419_v50 }
  0xac   : > { %v343_v23 = vsel %vm335_vm6, %v326_v9, %v342_v17  ;;  %v347_v24 = vsel %vm335_vm6, %v329_v10, %v346_v18  ;;  %v340_v29 = vsel %vm334_vm5, %v337_v12, %v339_v16  ;;  %v424_v32 = vshll.u32 %v1790_v54, %v1914_v44 }
  0xad   : > { %v344_v30 = vsel %vm334_vm5, %v341_v14, %v343_v23  ;;  %v348_v31 = vsel %vm334_vm5, %v345_v15, %v347_v24  ;;  %v423_v37 = vor.u32 %v422_v28, %v421_v27  ;;  %v425_v38 = vshrl.u32 %v1791_v56, %v419_v50 }
  0xae   : > { %v1947_v33 = vmul.u32.u64.low %v1916_v46, %v348_v31  ;;  %v1948_v34 = vmul.u32.u64.high %v1916_v46, %v348_v31, %v1947_v33  ;;  %v1951_v35 = vmul.u32.u64.low %v1916_v46, %v344_v30  ;;  %v1952_v36 = vmul.u32.u64.high %v1916_v46, %v344_v30, %v1951_v35 }
  0xaf   : > { %v427_v39 = vshll.u32 %v1791_v56, %v1914_v44  ;;  %v428_v40 = vshrl.u32 %v1792_v58, %v419_v50  ;;  %v356_v41 = vmul.u32 %v1916_v46, %v340_v29  ;;  %v430_v43 = vshll.u32 %v1792_v58, %v1914_v44 }
  0xb0   : > { %v431_v45 = vshrl.u32 %v1793_v63, %v419_v50  ;;  %v434_v48 = vshrl.u32 %v1794_v5, %v419_v50  ;;  %v426_v53 = vor.u32 %v425_v38, %v424_v32  ;;  %v433_v57 = vshll.u32 %v1793_v63, %v1914_v44 }
  0xb1   : > { %v429_v55 = vor.u32 %v428_v40, %v427_v39  ;;  %vm436_vm8 = vcmp.lt.s32.totalorder %v1920_v49, 1  ;;  %vm358_vm9 = vc.u32 %v1948_v34, %v1951_v35  ;;  %v359_v59 = vadd.s32 1, %v1952_v36 }
  0xb2   : > { %v432_v46 = vor.u32 %v431_v45, %v430_v43  ;;  %vm437_vm10 = vcmp.lt.s32.totalorder %v1920_v49, 2  ;;  %v435_v60 = vor.u32 %v434_v48, %v433_v57  ;;  %vm438_vm11 = vcmp.lt.s32.totalorder %v1920_v49, 3 }
  0xb3   : > { %vm439_vm12 = vcmp.lt.s32.totalorder %v1920_v49, 4  ;;  %v440_v50 = vsel %vm436_vm8, %v420_v22, %v423_v37  ;;  %v360_v44 = vsel %vm358_vm9, %v359_v59, %v1952_v36  ;;  %v444_v62 = vsel %vm436_vm8, %v423_v37, %v426_v53 }
  0xb4   : > { %v441_v61 = vsel %vm439_vm12, %v429_v55, 2102212464  ;;  %v445_v0 = vsel %vm439_vm12, %v432_v46, 920167782  ;;  %v361_v1 = vadd.s32 %v360_v44, %v356_v41  ;;  %v448_v7 = vsel %vm436_vm8, %v426_v53, %v429_v55 }
  0xb5   : > { %v442_v2 = vsel %vm438_vm11, %v426_v53, %v441_v61  ;;  %v446_v6 = vsel %vm438_vm11, %v429_v55, %v445_v0  ;;  %v522_v8 = vsub.s32 32, %v1924_v51  ;;  %v449_v10 = vsel %vm439_vm12, %v435_v60, 1326507024 }
  0xb6   : > { %v447_v9 = vsel %vm437_vm10, %v444_v62, %v446_v6  ;;  %v507_v11 = vand.u32 2147483647, %v1901_v21  ;;  %v362_v12 = vadd.s32 536870912, %v361_v1  ;;  %v450_v13 = vsel %vm438_vm11, %v432_v46, %v449_v10 }
  0xb7   : > { %v1991_v14 = vmul.u32.u64.low %v1918_v47, %v447_v9  ;;  %v1992_v15 = vmul.u32.u64.high %v1918_v47, %v447_v9, %v1991_v14  ;;  %v443_v16 = vsel %vm437_vm10, %v440_v50, %v442_v2  ;;  %v451_v17 = vsel %vm437_vm10, %v448_v7, %v450_v13 }
  0xb8   : > { %v1999_v18 = vshrl.u32 %v362_v12, 30  ;;  %v2002_v22 = vmul.u32.u64.low %v1918_v47, %v451_v17  ;;  %v2003_v23 = vmul.u32.u64.high %v1918_v47, %v451_v17, %v2002_v22  ;;  %v2006_v24 = vshrl.u32 %v1912_v42, 5 }
  0xb9   : > { %v514_v27 = vand.u32 8388607, %v507_v11  ;;  %v528_v28 = vshrl.u32 %v1791_v56, %v522_v8  ;;  %v459_v30 = vmul.u32 %v1918_v47, %v443_v16  ;;  %v462_v49 = vadd.s32 1, %v1992_v15 }
  0xba   : > { %v364_v29 = vshll.u32 %v1999_v18, 30  ;;  %v531_v31 = vshrl.u32 %v1792_v58, %v522_v8  ;;  %v524_v32 = vshll.u32 %v1789_v52, %v1924_v51  ;;  %v525_v33 = vshrl.u32 %v1790_v54, %v522_v8 }
  0xbb   : > { %v527_v42 = vshll.u32 %v1790_v54, %v1924_v51  ;;  %v534_v36 = vshrl.u32 %v1793_v63, %v522_v8  ;;  %vm461_vm13 = vc.u32 %v2003_v23, %v1991_v14  ;;  %v530_v47 = vshll.u32 %v1791_v56, %v1924_v51 }
  0xbc   : > { %v365_v37 = vsub.s32 %v361_v1, %v364_v29  ;;  %v533_v38 = vshll.u32 %v1792_v58, %v1924_v51  ;;  %v463_v39 = vsel %vm461_vm13, %v462_v49, %v1992_v15  ;;  %v536_v41 = vshll.u32 %v1793_v63, %v1924_v51 }
  0xbd   : > { %v529_v40 = vor.u32 %v528_v28, %v527_v42  ;;  %v537_v54 = vshrl.u32 %v1794_v5, %v522_v8  ;;  %v464_v45 = vadd.s32 %v463_v39, %v459_v30  ;;  %v532_v48 = vor.u32 %v531_v31, %v530_v47 }
  0xbe   : > { %v367_v43 = vsub.s32 0, %v365_v37  ;;  %v535_v53 = vor.u32 %v534_v36, %v533_v38  ;;  %v526_v55 = vor.u32 %v525_v33, %v524_v32  ;;  %v515_v46 = vor.u32 8388608, %v514_v27 }
  0xbf   : > { %v538_v57 = vor.u32 %v537_v54, %v536_v41  ;;  %v465_v56 = vadd.s32 536870912, %v464_v45  ;;  %vm539_vm14 = vcmp.lt.s32.totalorder %v2006_v24, 1  ;;  %vm542_vm15 = vcmp.lt.s32.totalorder %v2006_v24, 4 }
  0xc0   : > { %v1557_v59 = vmin.u32 %v367_v43, %v365_v37  ;;  %vm541_vm1 = vcmp.lt.s32.totalorder %v2006_v24, 3  ;;  %v548_v60 = vsel %vm542_vm15, %v535_v53, 920167782  ;;  %v551_v51 = vsel %vm539_vm14, %v529_v40, %v532_v48 }
  0xc1   : > { %v2036_v63 = vshrl.u32 %v465_v56, 30  ;;  %v547_v5 = vsel %vm539_vm14, %v526_v55, %v529_v40  ;;  %v549_v50 = vsel %vm541_vm1, %v532_v48, %v548_v60  ;;  %v552_v44 = vsel %vm542_vm15, %v538_v57, 1326507024 }
  0xc2   : > { %v369_v58 = vclz %v1557_v59  ;;  %vm540_vm2 = vcmp.lt.s32.totalorder %v2006_v24, 2  ;;  %v553_v62 = vsel %vm541_vm1, %v535_v53, %v552_v44  ;;  %v555_v0 = vshll.u32 %v515_v46, 8 }
  0xc3   : > { %v467_v1 = vshll.u32 %v2036_v63, 30  ;;  %v523_v2 = vshrl.u32 %v1789_v52, %v522_v8  ;;  %v544_v6 = vsel %vm542_vm15, %v532_v48, 2102212464  ;;  %v554_v7 = vsel %vm540_vm2, %v551_v51, %v553_v62 }
  0xc4   : > { %v1558_v61 = vadd.s32 4294967294, %v369_v58  ;;  %v550_v9 = vsel %vm540_vm2, %v547_v5, %v549_v50  ;;  %v2051_v10 = vmul.u32.u64.low %v555_v0, %v554_v7  ;;  %v2052_v12 = vmul.u32.u64.high %v555_v0, %v554_v7, %v2051_v10 }
  0xc5   : > { %v357_v13 = vadd.s32 %v1951_v35, %v1948_v34  ;;  %v468_v16 = vsub.s32 %v464_v45, %v467_v1  ;;  %v543_v52 = vsel %vm539_vm14, %v523_v2, %v526_v55  ;;  %v545_v8 = vsel %vm541_vm1, %v529_v40, %v544_v6 }
  0xc6   : > { %vm1559_vm3 = vcmp.lt.s32.totalorder %v1558_v61, 0  ;;  %v2060_v28 = vmul.u32.u64.low %v555_v0, %v550_v9  ;;  %v2061_v29 = vmul.u32.u64.high %v555_v0, %v550_v9, %v2060_v28  ;;  %v546_v34 = vsel %vm540_vm2, %v543_v52, %v545_v8 }
  0xc7   : > { %v372_v15 = vsel %vm1559_vm3, 0, %v1558_v61  ;;  %v470_v27 = vsub.s32 0, %v468_v16  ;;  %v562_v38 = vmul.u32 %v555_v0, %v546_v34  ;;  %v460_v48 = vadd.s32 %v1991_v14, %v2003_v23 }
  0xc8   : > { %v373_v17 = vsub.s32 32, %v372_v15  ;;  %v377_v22 = vsub.s32 4294967266, %v372_v15  ;;  %v374_v30 = vshll.u32 %v365_v37, %v372_v15  ;;  %vm564_vm4 = vc.u32 %v2052_v12, %v2060_v28 }
  0xc9   : > { %v1561_v32 = vmin.u32 %v470_v27, %v468_v16  ;;  %v565_v36 = vadd.s32 1, %v2061_v29  ;;  %v387_v59 = vsub.s32 4, %v1999_v18  ;;  %vm303_vm6 = vcmp.lt.s32.totalorder %v1897_v19, 0 }
  0xca   : > { %v375_v49 = vshrl.u32 %v357_v13, %v373_v17  ;;  %v378_v31 = vadd.s32 127, %v377_v22  ;;  %vm302_vm7 = vcmp.le.f32.partialorder %v301_v25, 0.7853982  ;;  %v490_v15 = vsub.s32 4, %v2036_v63 }
  0xcb   : > { %v472_v42 = vclz %v1561_v32  ;;  %v566_v40 = vsel %vm564_vm4, %v565_v36, %v2061_v29  ;;  %v388_v44 = vsel %vm303_vm6, %v387_v59, %v1999_v18  ;;  %vm406_vm8 = vcmp.lt.s32.totalorder %v1899_v20, 0 }
  0xcc   : > { %v376_v35 = vor.u32 %v375_v49, %v374_v30  ;;  %v379_v33 = vshll.u32 %v378_v31, 23  ;;  %v567_v54 = vadd.s32 %v566_v40, %v562_v38  ;;  %v390_v1 = vsel %vm302_vm7, 0, %v388_v44 }
  0xcd   : > { %v1562_v39 = vadd.s32 4294967294, %v472_v42  ;;  %v394_v25 = vand.u32 3, %v390_v1  ;;  %vm2085_vm9 = vcmp.le.f32.partialorder %v404_v26, 0.7853982  ;;  %v491_v29 = vsel %vm406_vm8, %v490_v15, %v2036_v63 }
  0xce   : > { %v380_v47 = vor.u32 4788187, %v379_v33  ;;  %v383_v41 = vcvt.s32.f32 %v376_v35  ;;  %v568_v45 = vadd.s32 536870912, %v567_v54  ;;  %v563_v26 = vadd.s32 %v2060_v28, %v2052_v12  ;;  %v923_v28 = vld [vmem:[%s1879_s7 + $0x8] sm:$0xff] }
  0xcf   : > { %vm1563_vm5 = vcmp.lt.s32.totalorder %v1562_v39, 0  ;;  %vm399_vm10 = vcmp.eq.s32.totalorder %v394_v25, 2  ;;  %vm396_vm12 = vcmp.eq.s32.totalorder %v394_v25, 0  ;;  %v703_v35 = vadd.s32 3, %v390_v1 }
  0xd0   : > { %v381_v37 = vand.u32 2147483647, %v380_v47  ;;  %v475_v24 = vsel %vm1563_vm5, 0, %v1562_v39  ;;  %v2073_v46 = vshrl.u32 %v568_v45, 30  ;;  %vm393_vm13 = vweird.f32 %v1897_v19 }
  0xd1   : > { %v476_v53 = vsub.s32 32, %v475_v24  ;;  %v480_v55 = vsub.s32 4294967266, %v475_v24  ;;  %v477_v56 = vshll.u32 %v468_v16, %v475_v24  ;;  %vm395_vm14 = vcmp.lt.s32.totalorder %v394_v25, 2 }
  0xd2   : > { %v384_v43 = vmul.f32 %v383_v41, %v381_v37  ;;  %v570_v5 = vshll.u32 %v2073_v46, 30  ;;  %v493_v36 = vsel %vm2085_vm9, 0, %v491_v29  ;;  %v704_v37 = vand.u32 3, %v703_v35  ;;  %v926_v41 = vld [vmem:[%s1879_s7 + $0x20] sm:$0xff] }
  0xd3   : > { %v478_v58 = vshrl.u32 %v460_v48, %v476_v53  ;;  %v481_v60 = vadd.s32 127, %v480_v55 }
  0xd4   : > { %v385_v57 = vxor.u32 2147483648, %v384_v43  ;;  %v571_v61 = vsub.s32 %v567_v54, %v570_v5  ;;  %v497_v54 = vand.u32 3, %v493_v36  ;;  %vm706_vm15 = vcmp.eq.s32.totalorder %v704_v37, 0 }
  0xd5   : > { %v479_v23 = vor.u32 %v478_v58, %v477_v56  ;;  %v482_v50 = vshll.u32 %v481_v60, 23  ;;  %vm709_vm2 = vcmp.eq.s32.totalorder %v704_v37, 2  ;;  %vm705_vm5 = vcmp.lt.s32.totalorder %v704_v37, 2 }
  0xd6   : > { %v386_v51 = vsel %vm303_vm6, %v385_v57, %v384_v43  ;;  %v573_v0 = vsub.s32 0, %v571_v61  ;;  %vm502_vm1 = vcmp.eq.s32.totalorder %v497_v54, 2  ;;  %v593_v57 = vsub.s32 4, %v2073_v46 }
  0xd7   : > { %v389_v14 = vsel %vm302_vm7, %v1897_v19, %v386_v51  ;;  %v483_v62 = vor.u32 4788187, %v482_v50  ;;  %v486_v6 = vcvt.s32.f32 %v479_v23  ;;  %vm499_vm3 = vcmp.eq.s32.totalorder %v497_v54, 0 }
  0xd8   : > { %1711 = vcosq.f32 %v389_v14  ;;  %v1565_v7 = vmin.u32 %v573_v0, %v571_v61  ;;  %vm498_vm4 = vcmp.lt.s32.totalorder %v497_v54, 2  ;;  %vm496_vm6 = vweird.f32 %v1899_v20 }
  0xd9   : > { %1713 = vsinq.f32 %v389_v14  ;;  %v484_v2 = vand.u32 2147483647, %v483_v62  ;;  %vm509_vm7 = vcmp.lt.s32.totalorder %v1901_v21, 0 }
  0xda   : > { %v575_v10 = vclz %v1565_v7  ;;  %v594_v0 = vsel %vm509_vm7, %v593_v57, %v2073_v46 }
  0xdb   : > { %v487_v9 = vmul.f32 %v486_v6, %v484_v2 }
  0xdc   : > { %v1566_v16 = vadd.s32 4294967294, %v575_v10 }
  0xdd   : > { %v488_v13 = vxor.u32 2147483648, %v487_v9 }
  0xde   : > { %vm1567_vm11 = vcmp.lt.s32.totalorder %v1566_v16, 0 }
  0xdf   : > { %v489_v17 = vsel %vm406_vm8, %v488_v13, %v487_v9  ;;  %v578_v30 = vsel %vm1567_vm11, 0, %v1566_v16  ;;  %vm508_vm8 = vcmp.le.f32.partialorder %v507_v11, 0.7853982  ;;  %v807_v11 = vadd.s32 3, %v493_v36 }
  0xe0   : > { %v492_v52 = vsel %vm2085_vm9, %v1899_v20, %v489_v17  ;;  %v579_v31 = vsub.s32 32, %v578_v30  ;;  %v583_v34 = vsub.s32 4294967266, %v578_v30  ;;  %v580_v47 = vshll.u32 %v571_v61, %v578_v30  ;;  %v925_v61 = vld [vmem:[%s1879_s7 + $0x18] sm:$0xff] }
  0xe1   : > { %1715 = vcosq.f32 %v492_v52  ;;  %v596_v6 = vsel %vm508_vm8, 0, %v594_v0  ;;  %v808_v7 = vand.u32 3, %v807_v11 }
  0xe2   : > { %v1712_v22 = vpop.eup %1711  ;;  %1717 = vsinq.f32 %v492_v52  ;;  %v581_v42 = vshrl.u32 %v563_v26, %v579_v31  ;;  %v584_v38 = vadd.s32 127, %v583_v34  ;;  %v911_v46 = vadd.s32 3, %v596_v6  ;;  %v927_v26 = vld [vmem:[%s1879_s7 + $0x28] sm:$0xff]  ;;  %s1727_s7 = sshll.u32 %s1796_s19, 4  ;;  %s1728_s7 = int_to_ptr.vmem [resolvable:$false] %s1727_s7 }
  0xe3   : > { %v1714_v8 = vpop.eup %1713  ;;  %v400_v27 = vxor.u32 2147483648, %v1712_v22  ;;  %v600_v9 = vand.u32 3, %v596_v6  ;;  %vm809_vm9 = vcmp.lt.s32.totalorder %v808_v7, 2  ;;  %vm810_vm11 = vcmp.eq.s32.totalorder %v808_v7, 0  ;;  %s1729_s8 = scalar_lea.vmem %s1728_s7, 96  ;;  %p1730_p0 = scmp.lt.s32.totalorder %s2143_s23, %s1728_s7 }
  0xe4   : > { %v397_v49 = vxor.u32 2147483648, %v1714_v8  ;;  %v582_v39 = vor.u32 %v581_v42, %v580_v47  ;;  %v585_v40 = vshll.u32 %v584_v38, 23  ;;  %v912_v25 = vand.u32 3, %v911_v46  ;;  %p1731_p1 = scmp.lt.s32.totalorder %s1729_s8, %s1723_s6 }
  0xe5   : > { %v401_v32 = vsel %vm399_vm10, %v400_v27, %v1714_v8  ;;  %v711_v60 = vsel %vm709_vm2, %v400_v27, %v1714_v8  ;;  %vm605_vm10 = vcmp.eq.s32.totalorder %v600_v9, 2 }
  0xe6   : > { %v398_v33 = vsel %vm396_vm12, %v1712_v22, %v397_v49  ;;  %v586_v43 = vor.u32 4788187, %v585_v40  ;;  %v589_v48 = vcvt.s32.f32 %v582_v39  ;;  %v708_v58 = vsel %vm706_vm15, %v1712_v22, %v397_v49  ;;  %p1732_p2 = por %p1731_p1, %p1730_p0 }
  0xe7   : > { %v402_v63 = vsel %vm395_vm14, %v398_v33, %v401_v32  ;;  %v712_v50 = vsel %vm705_vm5, %v708_v58, %v711_v60  ;;  %vm813_vm12 = vcmp.eq.s32.totalorder %v808_v7, 2  ;;  %vm602_vm14 = vcmp.eq.s32.totalorder %v600_v9, 0 }
  0xe8   : > { %v2100_v12 = vsel %vm393_vm13, nan, %v402_v63  ;;  %v587_v45 = vand.u32 2147483647, %v586_v43  ;;  %v713_v2 = vsel %vm393_vm13, nan, %v712_v50  ;;  %vm917_vm13 = vcmp.eq.s32.totalorder %v912_v25, 2  ;;  %p1733_p3 = pnand %p1732_p2, %p1726_p13 }
  0xe9   : > { %1616 = vmatprep.subr.mxu0 %v2100_v12  ;;  %vm914_vm15 = vcmp.eq.s32.totalorder %v912_v25, 0  ;;  %vm913_vm2 = vcmp.lt.s32.totalorder %v912_v25, 2 }
  0xea   : > { %1617 = vmatpush3.msra.mxu0 %v2100_v12  ;;  %v590_v56 = vmul.f32 %v589_v48, %v587_v45 }
  0xeb   : > { %1619 = vmatmul.mubr.msk.f32.vlgmr.msra.gmra.mrb[0].mxu0 %vm928_vm0, %v923_v28  ;;  %v1716_v24 = vpop.eup %1715 }
  0xec   : > { %1628 = vmatprep.mubr.msk.f32.mxu0 %vm928_vm0, %v926_v41  ;;  %v1718_v53 = vpop.eup %1717  ;;  %v503_v55 = vxor.u32 2147483648, %v1716_v24  ;;  %v591_v14 = vxor.u32 2147483648, %v590_v56 }
  0xed   : > { %v500_v59 = vxor.u32 2147483648, %v1718_v53 }
  0xee   : > { %v504_v51 = vsel %vm502_vm1, %v503_v55, %v1718_v53  ;;  %v592_v62 = vsel %vm509_vm7, %v591_v14, %v590_v56  ;;  %v815_v18 = vsel %vm813_vm12, %v503_v55, %v1718_v53  ;;  %vm601_vm1 = vcmp.lt.s32.totalorder %v600_v9, 2 }
  0xef   : > { %v501_v5 = vsel %vm499_vm3, %v1716_v24, %v500_v59  ;;  %v595_v1 = vsel %vm508_vm8, %v1901_v21, %v592_v62  ;;  %v812_v16 = vsel %vm810_vm11, %v1716_v24, %v500_v59  ;;  %vm599_vm3 = vweird.f32 %v1901_v21 }
  0xf0   : > { %v505_v23 = vsel %vm498_vm4, %v501_v5, %v504_v51  ;;  %1719 = vcosq.f32 %v595_v1  ;;  %v816_v27 = vsel %vm809_vm9, %v812_v16, %v815_v18  ;;  %v1795_v55 = vmov 0.0  }
  0xf1   : > { %v2113_v44 = vsel %vm496_vm6, nan, %v505_v23  ;;  %1721 = vsinq.f32 %v595_v1  ;;  %v817_v31 = vsel %vm496_vm6, nan, %v816_v27 }
  0xf2   : > { %1621 = vmatprep.subr.mxu1 %v2113_v44 }
  0xf3   : > { %1622 = vmatpush3.msra.mxu1 %v2113_v44 }
  0xf4   : > { %1624 = vmatmul.mubr.msk.f32.vlgmr.msra.gmra.mrb[0].mxu1 %vm928_vm0, %v925_v61  ;;  %1631 = vmatprep.subr.mxu1 %v713_v2 }
  0xf5   : > { %1632 = vmatpush3.msra.mxu1 %v713_v2  ;;  %1633 = vmatprep.mubr.msk.f32.mxu1 %vm928_vm0, %v1882_v3 }
  0xf8   : > { %1634 = vmatmul.mubr.msk.f32.vlgmr.msra.gmra.mrb[2].mxu1 %vm928_vm0, %v923_v28  ;;  %v1430_v28 = vlaneseq }
  0xf9   : > { %1643 = vmatprep.mubr.msk.f32.mxu1 %vm928_vm0, %v926_v41 }
  0xfa   : > { %v1720_v19 = vpop.eup %1719 }
  0xfb   : > { %v1722_v10 = vpop.eup %1721  ;;  %v606_v13 = vxor.u32 2147483648, %v1720_v19 }
  0xfc   : > { %v603_v15 = vxor.u32 2147483648, %v1722_v10 }
  0xfd   : > { %v607_v3 = vsel %vm605_vm10, %v606_v13, %v1722_v10  ;;  %v919_v17 = vsel %vm917_vm13, %v606_v13, %v1722_v10 }
  0xfe   : > { %v604_v22 = vsel %vm602_vm14, %v1720_v19, %v603_v15  ;;  %v916_v52 = vsel %vm914_vm15, %v1720_v19, %v603_v15 }
  0xff   : > { %v608_v8 = vsel %vm601_vm1, %v604_v22, %v607_v3  ;;  %v920_v29 = vsel %vm913_vm2, %v916_v52, %v919_v17 }
 0x100   : > { %v609_v30 = vsel %vm599_vm3, nan, %v608_v8  ;;  %v921_v49 = vsel %vm599_vm3, nan, %v920_v29 }
 0x101   : > { %1626 = vmatprep.subr.mxu0 %v609_v30  ;;  %1641 = vmatprep.subr.mxu1 %v921_v49 }
 0x102   : > { %1627 = vmatpush3.msra.mxu0 %v609_v30  ;;  %1642 = vmatpush3.msra.mxu1 %v921_v49 }
 0x103   : > { %1636 = vmatprep.subr.mxu0 %v817_v31  ;;  %1629 = vmatmul.mubr.msk.f32.vlgmr.msra.gmra.mrb[2].mxu0 %vm928_vm0, %v927_v26 }
 0x104   : > { %1637 = vmatpush3.msra.mxu0 %v817_v31  ;;  %1638 = vmatprep.mubr.msk.f32.mxu0 %vm928_vm0, %v1885_v4  ;;  %v1431_v4 = vand.u32 127, %v1430_v28 }
 0x105   : > { %1644 = vmatmul.mubr.msk.f32.vlgmr.msra.gmra.mrb[4].mxu1 %vm928_vm0, %v927_v26 }
 0x107   : > { %1639 = vmatmul.mubr.msk.f32.vlgmr.msra.gmra.mrb[4].mxu0 %vm928_vm0, %v925_v61  ;;  %vm1432_vm0 = vcmp.lt.s32.totalorder %v1431_v4, 11 }
 0x108   : > { %v1592_v57 = vsel %vm1432_vm0, 1.0, %v1795_v55 }
 0x1be   : > { %v1620_v21 = vpop.f32.mrb[0].mxu0 }
 0x1bf   : > { %v1001_v32 = vpop.f32.mrb[1].mxu0 }
 0x1c7   : > { %v1625_v34 = vpop.f32.mrb[0].mxu1 }
 0x1c8   : > { %v1082_v35 = vpop.f32.mrb[1].mxu1 }
 0x1cb   : > { %v1635_v33 = vpop.f32.mrb[2].mxu1 }
 0x1cc   : > { %v1397_v42 = vsub.f32 %v1001_v32, %v1635_v33  ;;  %v1238_v20 = vpop.f32.mrb[3].mxu1 }
 0x1cd   : > { %v1403_v63 = vadd.f32 %v1620_v21, %v1238_v20 }
 0x1ce   : > { %v1400_v36 = vmul.f32 %v1397_v42, %v2100_v12 }
 0x1cf   : > { %v1406_v47 = vmul.f32 %v1403_v63, %v713_v2 }
 0x1d1   : > { %v1409_v38 = vadd.f32 %v1406_v47, %v1400_v36 }
 0x1d3   : > { %v1412_v39 = vrot.slane %v1409_v38, 4 }
 0x1d5   : > { %v1413_v40 = vadd.f32 %v1412_v39, %v1409_v38 }
 0x1d6   : > { %v1630_v41 = vpop.f32.mrb[2].mxu0 }
 0x1d7   : > { %v1414_v37 = vrot.slane %v1413_v40, 2  ;;  %v1163_v43 = vpop.f32.mrb[3].mxu0 }
 0x1d8   : > { %v1645_v24 = vpop.f32.mrb[4].mxu1 }
 0x1d9   : > { %v1415_v54 = vadd.f32 %v1414_v37, %v1413_v40  ;;  %v1399_v48 = vsub.f32 %v1163_v43, %v1645_v24  ;;  %v1388_v53 = vpop.f32.mrb[5].mxu1 }
 0x1da   : > { %v1640_v59 = vpop.f32.mrb[4].mxu0  ;;  %v1405_v56 = vadd.f32 %v1630_v41, %v1388_v53 }
 0x1db   : > { %v1416_v45 = vrot.slane %v1415_v54, 1  ;;  %v1398_v58 = vsub.f32 %v1082_v35, %v1640_v59  ;;  %v1402_v60 = vmul.f32 %v1399_v48, %v609_v30  ;;  %v1313_v51 = vpop.f32.mrb[5].mxu0 }
 0x1dc   : > { %v1404_v5 = vadd.f32 %v1625_v34, %v1313_v51  ;;  %v1408_v14 = vmul.f32 %v1405_v56, %v921_v49 }
 0x1dd   : > { %v1417_v12 = vadd.f32 %v1416_v45, %v1415_v54  ;;  %v1401_v50 = vmul.f32 %v1398_v58, %v2113_v44 }
 0x1de   : > { %v1407_v61 = vmul.f32 %v1404_v5, %v817_v31  ;;  %v1411_v62 = vadd.f32 %v1408_v14, %v1402_v60 }
 0x1df   : > { %v1435_v23 = vmul.f32 %v1592_v57, %v1417_v12 }
 0x1e0   : > { %v1410_v0 = vadd.f32 %v1407_v61, %v1401_v50  ;;  %v1424_v1 = vrot.slane %v1411_v62, 4 }
 0x1e1   : > { %1438 = vadd.xlane.f32.xlu1 %v1435_v23 }
 0x1e2   : > { %v1418_v2 = vrot.slane %v1410_v0, 4  ;;  %v1425_v6 = vadd.f32 %v1424_v1, %v1411_v62 }
 0x1e4   : > { %v1419_v11 = vadd.f32 %v1418_v2, %v1410_v0  ;;  %v1426_v46 = vrot.slane %v1425_v6, 2 }
 0x1e6   : > { %v1420_v7 = vrot.slane %v1419_v11, 2  ;;  %v1427_v9 = vadd.f32 %v1426_v46, %v1425_v6 }
 0x1e8   : > { %v1421_v25 = vadd.f32 %v1420_v7, %v1419_v11  ;;  %v1428_v10 = vrot.slane %v1427_v9, 1 }
 0x1ea   : > { %v1422_v19 = vrot.slane %v1421_v25, 1  ;;  %v1429_v16 = vadd.f32 %v1428_v10, %v1427_v9 }
 0x1ec   : > { %v1423_v13 = vadd.f32 %v1422_v19, %v1421_v25  ;;  %v1437_v44 = vmul.f32 %v1592_v57, %v1429_v16 }
 0x1ee   : > { %v1436_v15 = vmul.f32 %v1592_v57, %v1423_v13 }
 0x1f0   : > { %1440 = vadd.xlane.f32.xlu1 %v1436_v15 }
 0x1f4   : > { %1442 = vadd.xlane.f32.xlu1 %v1437_v44 }
 0x26e   : > { %v1439_v18 = vpop.xlane.xlu1 %1438 }
 0x26f   : > { %v1444_v3 = vmul.f32 0.16666667, %v1439_v18 }
 0x271   : > { %1447 = vst [vmem:[%s221_s22] sm:$0x1] %v1444_v3 }
 0x27d   : > { %v1441_v17 = vpop.xlane.xlu1 %1440 }
 0x27e   : > { %v1445_v22 = vmul.f32 0.16666667, %v1441_v17 }
 0x280   : > { %1448 = vst [vmem:[%s221_s22 + $0x1] sm:$0x1] %v1445_v22 }
 0x281   : > { %v1443_v52 = vpop.xlane.xlu1 %1442 }
 0x282   : > { %v1446_v8 = vmul.f32 0.16666667, %v1443_v52 }
 0x284   : > { %1449 = vst [vmem:[%s221_s22 + $0x2] sm:$0x1] %v1446_v8 }
 0x285   : > { %1736 = shalt.err (!%p1733_p3)
}
 0x286   : > { %s1737_s9 = scalar_lea.hbm %s2148_s30, 48  ;;  %s1741_s12 = scalar_lea.hbm %s2195_s4, 96 }
 0x287   : > { %p1738_p4 = scmp.ne.s32.totalorder %s2148_s30, %s1737_s9  ;;  %p1742_p9 = scmp.lt.u32.totalorder %s2148_s30, %s2195_s4 }
 0x288   : > { %p1743_p10 = scmp.lt.u32.totalorder %s1741_s12, %s1737_s9  ;;  %p1745_p12 = scmp.lt.u32.totalorder %s1737_s9, %s2148_s30 }
 0x289   : > { %p1739_p7 = pnand %p1738_p4, %p1862_p5 }
 0x28a   : > { %p1744_p11 = por %p1743_p10, %p1742_p9 }
 0x28b   : > { %p1740_p8 = pneg %p1739_p7 }
 0x28c   : > { %p1746_p13 = por %p1745_p12, %p1744_p11 }
 0x28e   : > { %p1747_p0 = pnand %p1746_p13, %p1740_p8 }
 0x290   : > { %1750 = shalt.err (!%p1747_p0)
}
 0x291   : > { %s1797_s20 = smov 16   ;;  %s1798_s22 = smov 1  }
 0x292   : > { %1659 = dma.vmem_to_hbm [thread:$0]  (%p1862_p5), %s2143_s23, 48, %s2148_s30, %s2150_s5, %s1797_s20, %s1797_s20, %s1798_s22  }
 0x293 PF: > { %p1665_p1 = scmp.ge.s32.totalorder %s1785_s18, 2  ;;  %s1479_s27 = sand.u32 1, %s1773_s15  }
 0x294   : > { %s1480_s28 = scalar_lea.sflag [#allocation3], %s1479_s27 }
 0x295   : > { %p1662_p2 = pnand %p1665_p1, %p1866_p6 }
 0x297   : > { %1768 = dma.done.wait (!%p1662_p2), %s1480_s28, 48  }
 0x298   : > { %1770 = vsyncadd (!%p1662_p2), %s1480_s28, 4294967248  ;;  %p14_p3 = scmp.ge.s32.totalorder %s1849_s21, 4   ;;  %s2200_s15 = smov %s1777_s16 }
 0x299   : > { %s2201_s16 = smov %s1781_s17  ;;  %s2202_s17 = smov %s1860_s24 }
 0x29a   : > { %s2203_s18 = smov %s1849_s21  ;;  %16 = sbr.rel (!%p14_p3) target bundleno = 3 (0x3), region = 77 }
 0x2a1   :  { %1485 = vsyncpa [#allocation3], 1 }
 0x2a2   :  { %1487 = vsyncpa [#allocation3 + $0x1], 1 }

</bundles_post_ra>
